<compile_context>
chip_gen: v6e
topology: v6e:2x2x1
jax: 0.10.0
libtpu: 0.0.40
codegen_flags: <defaults>
</compile_context>

<pallas_src>
import functools
import math

import jax
import jax.numpy as jnp
from jax.experimental import pallas as pl
from jax.experimental.pallas import tpu as pltpu


def _round_up(x, m):
    return (x + m - 1) // m * m


def _vmem_capacity_bytes():
    try:
        return int(pltpu.get_tpu_info().vmem_capacity_bytes)
    except Exception:
        return 64 << 20  # conservative default: v7x per-TensorCore VMEM


def _proj_logsoftmax_kernel(x_ref, w_ref, b_ref, o_ref, m_ref, l_ref):
    # Grid: (row_tiles, vocab_tiles).  o_ref is the full (TM, v_p) row slab,
    # resident in VMEM across the vocab axis; written back to HBM once.
    j = pl.program_id(1)
    n_j = pl.num_programs(1)
    tn = w_ref.shape[1]

    @pl.when(j == 0)
    def _init():
        m_ref[...] = jnp.full(m_ref.shape, -jnp.inf, m_ref.dtype)
        l_ref[...] = jnp.zeros(l_ref.shape, l_ref.dtype)

    # (TM, TN) logits tile: bf16 operands, f32 accumulation on the MXU.
    logits = jnp.dot(x_ref[...], w_ref[...], preferred_element_type=jnp.float32)
    logits = logits + b_ref[...]  # bias stays f32; one broadcast per step

    # Online max / sum-exp in f32.
    m_prev = m_ref[...]
    m_new = jnp.maximum(m_prev, jnp.max(logits, axis=-1, keepdims=True))
    alpha = jnp.exp(m_prev - m_new)
    l_ref[...] = l_ref[...] * alpha + jnp.sum(
        jnp.exp(logits - m_new), axis=-1, keepdims=True)
    m_ref[...] = m_new

    # Stash the unnormalized logits into the resident output slab — no second
    # matmul pass / weight re-stream is ever needed.
    col = pl.multiple_of(j * tn, tn)
    o_ref[:, pl.ds(col, tn)] = logits.astype(o_ref.dtype)

    @pl.when(j == n_j - 1)
    def _finalize():
        lse = m_ref[...] + jnp.log(l_ref[...])
        o_ref[...] = (o_ref[...].astype(jnp.float32) - lse).astype(o_ref.dtype)


def _pick_tiles(rows, d_p, v_p, c_bytes, o_bytes, budget,
                row_tile=None, vocab_tile=None):
    """Pick (TM, TN) maximizing TM first (weight-traffic lever), then TN
    (per-step overhead lever), under the VMEM budget."""

    def footprint(tm, tn):
        return (2 * tm * d_p * c_bytes        # x row tile (double-buffered)
                + 2 * d_p * tn * c_bytes      # weight tile (double-buffered)
                + 2 * 8 * tn * 4              # bias tile (sublane-padded)
                + 2 * tm * v_p * o_bytes      # resident output row slab
                + 2 * tm * 128 * 4)           # m/l scratch (lane-padded)

    tn_opts = [t for t in (1024, 512, 256, 128) if t <= v_p and v_p % t == 0]
    if not tn_opts:
        tn_opts = [v_p]
    if vocab_tile is not None:
        tn_opts = [vocab_tile]

    tm_cap = max(8, _round_up(max(rows, 1), 8))
    tm_opts = [t for t in (512, 384, 256, 128, 64, 32, 16, 8) if t <= tm_cap]
    if not tm_opts:
        tm_opts = [8]
    if row_tile is not None:
        tm_opts = [row_tile]

    for tm in tm_opts:
        for tn in tn_opts:
            if footprint(tm, tn) <= budget:
                return tm, tn, footprint(tm, tn)
    tm, tn = tm_opts[-1], tn_opts[-1]
    return tm, tn, footprint(tm, tn)


def prepare_projection_params(weight_t, bias, *, compute_dtype=jnp.bfloat16):
    """One-time weight prep (hoist out of the per-call hot path): cast the
    (d_model, vocab) weight to the MXU compute dtype and pad to lane-aligned
    shapes.  Padded vocab columns get a -1e30 bias so they vanish from the
    softmax."""
    d_model, vocab = weight_t.shape
    assert bias.shape == (vocab,)
    d_p = _round_up(d_model, 128)
    v_p = _round_up(vocab, 128)
    w_p = jnp.pad(weight_t.astype(compute_dtype),
                  ((0, d_p - d_model), (0, v_p - vocab)))
    b_p = jnp.pad(bias.astype(jnp.float32), (0, v_p - vocab),
                  constant_values=-1e30).reshape(1, v_p)
    return w_p, b_p


def projection_forward(x, w_padded, b_padded, *, vocab,
                       out_dtype=jnp.float32, row_tile=None, vocab_tile=None):
    """log_softmax(x @ W + b, axis=-1) using pre-padded params.

    x:        (..., d_model)
    w_padded: (d_p, v_p)  from prepare_projection_params
    b_padded: (1, v_p)    from prepare_projection_params
    returns:  (..., vocab) in out_dtype
    """
    d_model = x.shape[-1]
    lead = x.shape[:-1]
    rows = int(math.prod(lead)) if lead else 1
    d_p, v_p = w_padded.shape
    assert d_p >= d_model and d_p % 128 == 0 and v_p % 128 == 0
    assert b_padded.shape == (1, v_p) and v_p >= vocab

    compute_dtype = w_padded.dtype
    c_bytes = jnp.dtype(compute_dtype).itemsize
    o_bytes = jnp.dtype(out_dtype).itemsize

    cap = _vmem_capacity_bytes()
    budget = int(0.70 * cap)
    tm, tn, fp = _pick_tiles(rows, d_p, v_p, c_bytes, o_bytes, budget,
                             row_tile=row_tile, vocab_tile=vocab_tile)
    assert tm % 8 == 0 and tn % 128 == 0 and v_p % tn == 0

    rows_p = _round_up(max(rows, 1), tm)
    n_i, n_j = rows_p // tm, v_p // tn

    x2d = x.reshape(rows, d_model).astype(compute_dtype)
    x2d = jnp.pad(x2d, ((0, rows_p - rows), (0, d_p - d_model)))

    vmem_limit = min(int(0.85 * cap),
                     max(32 << 20, int(1.2 * fp) + (2 << 20)))

    out = pl.pallas_call(
        _proj_logsoftmax_kernel,
        out_shape=jax.ShapeDtypeStruct((rows_p, v_p), out_dtype),
        grid_spec=pltpu.PrefetchScalarGridSpec(
            num_scalar_prefetch=0,
            grid=(n_i, n_j),
            in_specs=[
                pl.BlockSpec((tm, d_p), lambda i, j: (i, 0)),   # x row tile
                pl.BlockSpec((d_p, tn), lambda i, j: (0, j)),   # weight tile
                pl.BlockSpec((1, tn),   lambda i, j: (0, j)),   # bias tile
            ],
            # Output block index depends on i only -> the (tm, v_p) row slab
            # stays resident in VMEM across the vocab axis and is written back
            # to HBM exactly once per row tile.
            out_specs=pl.BlockSpec((tm, v_p), lambda i, j: (i, 0)),
            scratch_shapes=[
                pltpu.VMEM((tm, 1), jnp.float32),   # running max
                pltpu.VMEM((tm, 1), jnp.float32),   # running sum-exp
            ],
        ),
        compiler_params=pltpu.CompilerParams(
            dimension_semantics=("parallel", "arbitrary"),
            vmem_limit_bytes=vmem_limit,
        ),
    )(x2d, w_padded, b_padded)

    return out[:rows, :vocab].reshape(*lead, vocab)


def projection_layer(x, weight_t, bias, *, compute_dtype=jnp.bfloat16, **kwargs):
    """Convenience one-shot wrapper (prepare + forward).  For repeated calls,
    hoist prepare_projection_params out of the hot path."""
    w_p, b_p = prepare_projection_params(weight_t, bias,
                                         compute_dtype=compute_dtype)
    return projection_forward(x, w_p, b_p, vocab=weight_t.shape[1], **kwargs)


if __name__ == "__main__":
    # Small shapes implied by the module: (batch, seq, d_model) -> (batch, seq, vocab)
    batch, seq, d_model, vocab = 2, 8, 32, 512

    key = jax.random.PRNGKey(0)
    kx, kw, kb = jax.random.split(key, 3)

    # nn.Linear default init: U(-1/sqrt(d_model), 1/sqrt(d_model)).
    bound = 1.0 / math.sqrt(d_model)
    weight_t = jax.random.uniform(
        kw, (d_model, vocab), jnp.float32, minval=-bound, maxval=bound)
    bias = jax.random.uniform(
        kb, (vocab,), jnp.float32, minval=-bound, maxval=bound)
    x = jax.random.normal(kx, (batch, seq, d_model), jnp.float32)

    # One-time weight prep (bf16 cast + pad) hoisted out of the per-call path.
    w_p, b_p = prepare_projection_params(weight_t, bias)

    # vocab_tile=128 forces 4 vocab tiles so the online log-softmax and the
    # resident-slab store path are exercised; also run the default tiling.
    fwd_multi = jax.jit(functools.partial(projection_forward, vocab=vocab,
                                          vocab_tile=128))
    out = jax.block_until_ready(fwd_multi(x, w_p, b_p))
    assert out.shape == (batch, seq, vocab)
    assert bool(jnp.all(jnp.isfinite(out)))

    # Reference with the same bf16 MXU operands / f32 accumulation.
    logits_ref = jnp.dot(
        x.reshape(-1, d_model).astype(jnp.bfloat16),
        weight_t.astype(jnp.bfloat16),
        preferred_element_type=jnp.float32,
    ) + bias
    ref = jax.nn.log_softmax(logits_ref, axis=-1).reshape(batch, seq, vocab)
    assert jnp.allclose(out, ref, atol=1e-3, rtol=1e-3), (
        float(jnp.max(jnp.abs(out - ref))))

    fwd_default = jax.jit(functools.partial(projection_forward, vocab=vocab))
    out2 = jax.block_until_ready(fwd_default(x, w_p, b_p))
    assert jnp.allclose(out2, ref, atol=1e-3, rtol=1e-3), (
        float(jnp.max(jnp.abs(out2 - ref))))

    print("KERNEL_OK")
</pallas_src>

<mosaic_0001>
module attributes {stable_mosaic.version = 11 : i64} {
  func.func @_proj_logsoftmax_kernel(%arg0: i32, %arg1: i32, %arg2: memref<16x128xbf16, #tpu.memory_space<vmem>>, %arg3: memref<128x128xbf16, #tpu.memory_space<vmem>>, %arg4: memref<1x128xf32, #tpu.memory_space<vmem>>, %arg5: memref<16x512xf32, #tpu.memory_space<vmem>>, %arg6: memref<16x1xf32, #tpu.memory_space<vmem>>, %arg7: memref<16x1xf32, #tpu.memory_space<vmem>>) attributes {dimension_semantics = [#tpu.dimension_semantics<parallel>, #tpu.dimension_semantics<arbitrary>], iteration_bounds = array<i64: 1, 4>, scalar_prefetch = 0 : i64, scratch_operands = 2 : i64, tpu.core_type = #tpu.core_type<tc>, window_params = [{transform_indices = @transform_0, window_bounds = array<i64: 16, 128>}, {transform_indices = @transform_1, window_bounds = array<i64: 128, 128>}, {transform_indices = @transform_2, window_bounds = array<i64: 1, 128>}, {transform_indices = @transform_3, window_bounds = array<i64: 16, 512>}]} {
    %c0_i32 = arith.constant 0 : i32
    %0 = arith.cmpi eq, %arg1, %c0_i32 : i32
    %1 = arith.extui %0 : i1 to i32
    %c0_i32_0 = arith.constant 0 : i32
    %2 = arith.cmpi ne, %1, %c0_i32_0 : i32
    scf.if %2 {
      %cst_18 = arith.constant 0xFF800000 : f32
      %32 = vector.broadcast %cst_18 : f32 to vector<16x1xf32>
      %c0_19 = arith.constant 0 : index
      %c0_20 = arith.constant 0 : index
      %33 = vector.load %arg6[%c0_19, %c0_20] : memref<16x1xf32, #tpu.memory_space<vmem>>, vector<16x1xf32>
      tpu.vector_store %arg6[%c0_19, %c0_20], %32 {strides = array<i32>} : memref<16x1xf32, #tpu.memory_space<vmem>>, vector<16x1xf32>,
      %cst_21 = arith.constant 0.000000e+00 : f32
      %34 = vector.broadcast %cst_21 : f32 to vector<16x1xf32>
      %c0_22 = arith.constant 0 : index
      %c0_23 = arith.constant 0 : index
      %35 = vector.load %arg7[%c0_22, %c0_23] : memref<16x1xf32, #tpu.memory_space<vmem>>, vector<16x1xf32>
      tpu.vector_store %arg7[%c0_22, %c0_23], %34 {strides = array<i32>} : memref<16x1xf32, #tpu.memory_space<vmem>>, vector<16x1xf32>,
    } else {
    }
    %c0 = arith.constant 0 : index
    %c0_1 = arith.constant 0 : index
    %3 = vector.load %arg2[%c0, %c0_1] : memref<16x128xbf16, #tpu.memory_space<vmem>>, vector<16x128xbf16>
    %c0_2 = arith.constant 0 : index
    %c0_3 = arith.constant 0 : index
    %4 = vector.load %arg3[%c0_2, %c0_3] : memref<128x128xbf16, #tpu.memory_space<vmem>>, vector<128x128xbf16>
    %cst = arith.constant dense<0.000000e+00> : vector<16x128xf32>
    %5 = tpu.matmul %3, %4, %cst {dimension_numbers = #tpu.dot_dimension_numbers<[1], [0], [0], [1], [0, 0, 1, 1], [], []>} : vector<16x128xbf16>, vector<128x128xbf16>, vector<16x128xf32> -> vector<16x128xf32>
    %c0_4 = arith.constant 0 : index
    %c0_5 = arith.constant 0 : index
    %6 = vector.load %arg4[%c0_4, %c0_5] : memref<1x128xf32, #tpu.memory_space<vmem>>, vector<1x128xf32>
    %7 = vector.broadcast %6 : vector<1x128xf32> to vector<16x128xf32>
    %8 = arith.addf %5, %7 : vector<16x128xf32>
    %c0_6 = arith.constant 0 : index
    %c0_7 = arith.constant 0 : index
    %9 = vector.load %arg6[%c0_6, %c0_7] : memref<16x1xf32, #tpu.memory_space<vmem>>, vector<16x1xf32>
    %cst_8 = arith.constant dense<0xFF800000> : vector<16xf32>
    %10 = vector.multi_reduction <maximumf>, %8, %cst_8 [1] : vector<16x128xf32> to vector<16xf32>
    %11 = vector.shape_cast %10 : vector<16xf32> to vector<16x1xf32>
    %12 = arith.maximumf %9, %11 : vector<16x1xf32>
    %13 = arith.subf %9, %12 : vector<16x1xf32>
    %14 = math.exp %13 : vector<16x1xf32>
    %c0_9 = arith.constant 0 : index
    %c0_10 = arith.constant 0 : index
    %15 = vector.load %arg7[%c0_9, %c0_10] : memref<16x1xf32, #tpu.memory_space<vmem>>, vector<16x1xf32>
    %16 = arith.mulf %15, %14 : vector<16x1xf32>
    %17 = vector.broadcast %12 : vector<16x1xf32> to vector<16x128xf32>
    %18 = arith.subf %8, %17 : vector<16x128xf32>
    %19 = math.exp %18 : vector<16x128xf32>
    %cst_11 = arith.constant dense<0.000000e+00> : vector<16xf32>
    %20 = vector.multi_reduction <add>, %19, %cst_11 [1] : vector<16x128xf32> to vector<16xf32>
    %21 = vector.shape_cast %20 : vector<16xf32> to vector<16x1xf32>
    %22 = arith.addf %16, %21 : vector<16x1xf32>
    %c0_12 = arith.constant 0 : index
    %c0_13 = arith.constant 0 : index
    %23 = vector.load %arg7[%c0_12, %c0_13] : memref<16x1xf32, #tpu.memory_space<vmem>>, vector<16x1xf32>
    tpu.vector_store %arg7[%c0_12, %c0_13], %22 {strides = array<i32>} : memref<16x1xf32, #tpu.memory_space<vmem>>, vector<16x1xf32>,
    %c0_14 = arith.constant 0 : index
    %c0_15 = arith.constant 0 : index
    %24 = vector.load %arg6[%c0_14, %c0_15] : memref<16x1xf32, #tpu.memory_space<vmem>>, vector<16x1xf32>
    tpu.vector_store %arg6[%c0_14, %c0_15], %12 {strides = array<i32>} : memref<16x1xf32, #tpu.memory_space<vmem>>, vector<16x1xf32>,
    %c128_i32 = arith.constant 128 : i32
    %25 = arith.muli %arg1, %c128_i32 : i32
    %26 = tpu.assume_multiple %25, 128 : i32
    %c0_16 = arith.constant 0 : index
    %27 = arith.index_cast %26 : i32 to index
    %28 = vector.load %arg5[%c0_16, %27] : memref<16x512xf32, #tpu.memory_space<vmem>>, vector<16x128xf32>
    tpu.vector_store %arg5[%c0_16, %27], %8 {strides = array<i32>} : memref<16x512xf32, #tpu.memory_space<vmem>>, vector<16x128xf32>,
    %c3_i32 = arith.constant 3 : i32
    %29 = arith.cmpi eq, %arg1, %c3_i32 : i32
    %30 = arith.extui %29 : i1 to i32
    %c0_i32_17 = arith.constant 0 : i32
    %31 = arith.cmpi ne, %30, %c0_i32_17 : i32
    scf.if %31 {
      %c0_18 = arith.constant 0 : index
      %c0_19 = arith.constant 0 : index
      %32 = vector.load %arg6[%c0_18, %c0_19] : memref<16x1xf32, #tpu.memory_space<vmem>>, vector<16x1xf32>
      %c0_20 = arith.constant 0 : index
      %c0_21 = arith.constant 0 : index
      %33 = vector.load %arg7[%c0_20, %c0_21] : memref<16x1xf32, #tpu.memory_space<vmem>>, vector<16x1xf32>
      %34 = math.log %33 : vector<16x1xf32>
      %35 = arith.addf %32, %34 : vector<16x1xf32>
      %c0_22 = arith.constant 0 : index
      %c0_23 = arith.constant 0 : index
      %36 = vector.load %arg5[%c0_22, %c0_23] : memref<16x512xf32, #tpu.memory_space<vmem>>, vector<16x512xf32>
      %37 = vector.broadcast %35 : vector<16x1xf32> to vector<16x512xf32>
      %38 = arith.subf %36, %37 : vector<16x512xf32>
      %c0_24 = arith.constant 0 : index
      %c0_25 = arith.constant 0 : index
      %39 = vector.load %arg5[%c0_24, %c0_25] : memref<16x512xf32, #tpu.memory_space<vmem>>, vector<16x512xf32>
      tpu.vector_store %arg5[%c0_24, %c0_25], %38 {strides = array<i32>} : memref<16x512xf32, #tpu.memory_space<vmem>>, vector<16x512xf32>,
    } else {
    }
    return
  }
  func.func @transform_0(%arg0: i32, %arg1: i32) -> (i32, i32) {
    %c0_i32 = arith.constant 0 : i32
    %c0_i32_0 = arith.constant 0 : i32
    return %arg0, %c0_i32 : i32, i32
  }
  func.func @transform_1(%arg0: i32, %arg1: i32) -> (i32, i32) {
    %c0_i32 = arith.constant 0 : i32
    %c0_i32_0 = arith.constant 0 : i32
    return %c0_i32, %arg1 : i32, i32
  }
  func.func @transform_2(%arg0: i32, %arg1: i32) -> (i32, i32) {
    %c0_i32 = arith.constant 0 : i32
    %c0_i32_0 = arith.constant 0 : i32
    return %c0_i32, %arg1 : i32, i32
  }
  func.func @transform_3(%arg0: i32, %arg1: i32) -> (i32, i32) {
    %c0_i32 = arith.constant 0 : i32
    %c0_i32_0 = arith.constant 0 : i32
    return %arg0, %c0_i32 : i32, i32
  }
}

</mosaic_0001>

<bundles_post_ra>
// kernel: projection_forward.1
= control target key start
LH: loop header
LB: loop body
LE: loop exit
PB: predicated region body
PF: predicated region fallthrough
CT: control target
= control target key end

     0   :  { %8 = vsyncpa [#allocation5], 0  ;;  %s998_s0 = inlined_call_operand.vmem [shape: bf16[16,128], index: 0, kind: input, shape index: {}]   ;;  %s999_s1 = inlined_call_operand.hbm [shape: bf16[128,512], index: 1, kind: input, shape index: {}]   ;;  %s1000_s2 = inlined_call_operand.vmem [shape: f32[1,512], index: 2, kind: input, shape index: {}]   ;;  %s1001_s3 = inlined_call_operand.hbm [shape: f32[16,512], index: 3, kind: output, shape index: {}]  }
   0x1   :  { %10 = vsyncpa [#allocation5 + $0x1], 0 }
   0x2   :  { %11 = vsyncpa [#allocation6], 0  ;;  %s853_s12 = smov 0   ;;  %s855_s13 = smov 0  }
   0x3   :  { %s857_s14 = smov 0   ;;  %s859_s15 = smov 0  }
   0x4   :  { %s861_s16 = smov 0   ;;  %s863_s17 = smov 0  }
   0x5 LB: > { %s560_s18 = sadd.s32 4294967295, %s818_s17   ;;  %s26_s19 = sadd.s32 1, %s814_s16  ;;  %s818_s17 = sphi %s863_s17, %s17_s17   ;;  %s814_s16 = sphi %s861_s16, %s1010_s16   ;;  %s810_s15 = sphi %s859_s15, %s1009_s15   ;;  %s806_s14 = sphi %s857_s14, %s1008_s14   ;;  %s802_s13 = sphi %s855_s13, %s1007_s13   ;;  %s798_s12 = sphi %s853_s12, %s1006_s12  }
   0x6   : > { %p27_p0 = scmp.ge.s32.totalorder %s26_s19, 4  ;;  %s62_s20 = sadd.s32 1, %s806_s14 }
   0x7   : > { %p69_p1 = scmp.ne.s32.totalorder %s806_s14, %s802_s13  ;;  %p70_p2 = scmp.eq.s32.totalorder %s818_s17, 0 }
   0x8   : > { %s1012_s19 = smov (%p27_p0, %s26_s19), 0  ;;  %p75_p4 = scmp.ne.s32.totalorder %s802_s13, %s798_s12 }
   0x9   : > { %p889_p3 = por %p70_p2, %p69_p1  ;;  %s59_s22 = ssub.s32 %s814_s16, %s1012_s19 }
   0xa   : > { %p76_p5 = scmp.eq.s32.totalorder %s560_s18, 0  ;;  %p60_p6 = scmp.eq.s32.totalorder %s59_s22, 0 }
   0xb   : > { %p625_p8 = scmp.lt.s32.totalorder %s818_s17, 4  ;;  %s160_s25 = sand.u32 1, %s806_s14  }
   0xc   : > { %p898_p7 = por %p76_p5, %p75_p4  ;;  %s565_s26 = sshll.u32 %s814_s16, 6 }
   0xd   : > { %s904_s24 = scalar_select %p60_p6, %s806_s14, %s62_s20  }
   0xe   : > { %s564_s27 = sshll.u32 %s160_s25, 6  ;;  %s169_s30 = scalar_lea.hbm %s999_s1, %s565_s26 }
   0xf   : > { %s164_s4 = scalar_lea.vmem [#allocation4], %s564_s27  ;;  %p913_p9 = pnand %p625_p8, %p889_p3 }
  0x10   : > { %s170_s5 = sshll.u32 %s164_s4, 4  ;;  %p566_p10 = scmp.ge.s32.totalorder %s818_s17, 1  ;;  %s171_s5 = int_to_ptr.vmem [resolvable:$true] %s170_s5 }
  0x11   : > { %s161_s7 = scalar_lea.sflag [#allocation5], %s160_s25  ;;  %p714_p11 = pneg %p913_p9 }
  0x12   : > { %s725_s8 = scalar_lea.vmem %s171_s5, 1024  ;;  %s820_s9 = smov [#allocation4]  }
  0x13   : > { %p726_p12 = scmp.ne.s32.totalorder %s171_s5, %s725_s8  ;;  %s730_s10 = sshll.u32 %s820_s9, 4  ;;  %s731_s10 = int_to_ptr.vmem [resolvable:$false] %s730_s10 }
  0x14   : > { %s732_s11 = scalar_lea.vmem %s731_s10, 2048  ;;  %p733_p1 = scmp.lt.s32.totalorder %s171_s5, %s731_s10 }
  0x15   : > { %p728_p13 = pnand %p726_p12, %p714_p11  ;;  %p734_p2 = scmp.lt.s32.totalorder %s732_s11, %s725_s8 }
  0x17   : > { %p729_p0 = pneg %p728_p13  ;;  %p735_p3 = por %p734_p2, %p733_p1 }
  0x19   : > { %p736_p4 = pnand %p735_p3, %p729_p0 }
  0x1b   : > { %739 = shalt.err (!%p736_p4)
}
  0x1c   : > { %s821_s12 = smov 256   ;;  %s822_s20 = smov 64  }
  0x1d   : > { %s823_s21 = smov 4   ;;  %p184_p5 = scmp.lt.s32.totalorder %s818_s17, 5 }
  0x1e   : > { %624 = dma.hbm_to_vmem [thread:$0]  (!%p913_p9), %s169_s30, 1024, %s171_s5, %s161_s7, %s821_s12, %s822_s20, %s823_s21  }
  0x1f   : > { %p185_p6 = pnand %p566_p10, %p184_p5 }
  0x20   : > { %s190_s22 = sand.u32 (!%p185_p6), 1, %s802_s13  }
  0x21   : > { %188 = sbr.rel (%p185_p6) target bundleno = 874 (0x36a), region = 32  ;;  %s567_s25 = sshll.u32 (!%p185_p6), %s190_s22, 6 }
  0x22   : > { %s191_s26 = scalar_lea.sflag (!%p185_p6), [#allocation5], %s190_s22  ;;  %s926_s27 = scalar_lea.vmem (!%p185_p6), [#allocation4], %s567_s25 }
  0x26   : > { %789 = dma.done.wait (%p898_p7), %s191_s26, 1024  }
  0x27   : > { %791 = vsyncadd (%p898_p7), %s191_s26, 4294966272  ;;  %p226_p8 = scmp.lt.s32.totalorder %s810_s15, 3  ;;  %p568_p9 = scmp.ne.s32.totalorder %s810_s15, 0 }
  0x29   : > { %s934_s28 = scalar_select %p226_p8, %s810_s15, 3 }
  0x2a   : > { %234 = sbr.rel (%p568_p9) target bundleno = 50 (0x32), region = 40 }
  0x2b   : > { %s228_s4 = scalar_lea.vmem %s1000_s2, %s934_s28 }
  0x2f   : > { %vm235_vm0 = vcmask 7168   ;;  %v824_v0 = vmov -inf   ;;  %v825_v1 = vmov 0.0  }
  0x30   : > { %236 = vst.msk [vmem:[#allocation2] sm:$0xff] %vm235_vm0, %v824_v0  ;;  %237 = vst.msk [vmem:[#allocation2 + $0x8] sm:$0xff] %vm235_vm0, %v824_v0 }
  0x31   : > { %238 = vst.msk [vmem:[#allocation3] sm:$0xff] %vm235_vm0, %v825_v1  ;;  %239 = vst.msk [vmem:[#allocation3 + $0x8] sm:$0xff] %vm235_vm0, %v825_v1 }
  0x32 PF: > { %v690_v2 = vld [vmem:[%s926_s27 + $0x38] sm:$0xff]   ;;  %v826_v3 = vmov 0.0   ;;  %v691_v4 = vld [vmem:[%s926_s27 + $0x30] sm:$0xff]   ;;  %vm827_vm1 = vmmov 0   ;;  %v692_v5 = vld [vmem:[%s926_s27 + $0x28] sm:$0xff]   ;;  %s579_s6 = sshll.u32 %s810_s15, 7 }
  0x33   : > { %595 = vmatprep.subr.bf16.mxu0 %v826_v3  ;;  %611 = vmatprep.mubr.msk.bf16.mxu0 %vm827_vm1, %v826_v3  ;;  %v693_v6 = vld [vmem:[%s926_s27 + $0x20] sm:$0xff]   ;;  %v694_v7 = vld [vmem:[%s926_s27 + $0x18] sm:$0xff]   ;;  %v695_v8 = vld [vmem:[%s926_s27 + $0x10] sm:$0xff]   ;;  %s406_s7 = sshra.s32 %s579_s6, 7  ;;  %v828_v19 = vmov 0   ;;  %vm400_vm2 = vcmask 7168  }
  0x34   : > { %596 = vmatpush3.bf16.msra.mxu0 %v690_v2  ;;  %v696_v9 = vld [vmem:[%s926_s27 + $0x8] sm:$0xff]   ;;  %v697_v10 = vld [vmem:[%s926_s27] sm:$0xff]   ;;  %s580_s8 = sshll.u32 %s406_s7, 3  ;;  %688 = vset.pattern.permute.xlu1 %v828_v19  ;;  %p581_p7 = scmp.ne.s32.totalorder %s810_s15, 3 }
  0x35   : > { %597 = vmatprep.subr.bf16.mxu0 %v826_v3  ;;  %v698_v11 = vld [vmem:[%s998_s0] sm:$0xff]   ;;  %s409_s11 = scalar_lea.vmem [#allocation7], %s580_s8  ;;  %689 = vset.pattern.permute.xlu0 %v828_v19 }
  0x36   : > { %v569_v12 = vld [vmem:[%s228_s4] ss:$0 sm:$0xff] }
  0x37   : > { %v360_v20 = vld [vmem:[#allocation2] sm:$0xff]  ;;  %v361_v23 = vld [vmem:[#allocation2 + $0x8] sm:$0xff] }
  0x38   : > { %598 = vmatpush3.bf16.msra.mxu0 %v691_v4  ;;  %v374_v39 = vld [vmem:[#allocation3] sm:$0xff]  ;;  %v375_v43 = vld [vmem:[#allocation3 + $0x8] sm:$0xff] }
  0x39   : > { %599 = vmatprep.subr.bf16.mxu0 %v826_v3 }
  0x3c   : > { %600 = vmatpush3.bf16.msra.mxu0 %v692_v5 }
  0x3d   : > { %601 = vmatprep.subr.bf16.mxu0 %v826_v3 }
  0x40   : > { %602 = vmatpush3.bf16.msra.mxu0 %v693_v6 }
  0x41   : > { %603 = vmatprep.subr.bf16.mxu0 %v826_v3 }
  0x44   : > { %604 = vmatpush3.bf16.msra.mxu0 %v694_v7 }
  0x45   : > { %605 = vmatprep.subr.bf16.mxu0 %v826_v3 }
  0x48   : > { %606 = vmatpush3.bf16.msra.mxu0 %v695_v8 }
  0x49   : > { %607 = vmatprep.subr.bf16.mxu0 %v826_v3 }
  0x4c   : > { %608 = vmatpush3.bf16.msra.mxu0 %v696_v9 }
  0x4d   : > { %609 = vmatprep.subr.bf16.mxu0 %v826_v3 }
  0x50   : > { %610 = vmatpush3.bf16.msra.mxu0 %v697_v10 }
  0x53   : > { %612 = vmatmul.mubr.bf16.vlgmr.msra.gmra.mxu0 %v698_v11 }
 0x113   : > { %v353_v13 = vpop.f32.mrf.mxu0 }
 0x114   : > { %v354_v14 = vadd.f32 %v569_v12, %v353_v13 }
 0x115   : > { %v613_v15 = vpop.f32.mrf.mxu0 }
 0x116   : > { %410 = vst [vmem:[%s409_s11] sm:$0xff] %v354_v14  ;;  %362 = vmax.xlane.f32.xlu0 %v354_v14 }
 0x117   : > { %v356_v16 = vpop.f32.mrf.mxu0 }
 0x118   : > { %v357_v17 = vadd.f32 %v569_v12, %v356_v16 }
 0x119   : > { %v614_v18 = vpop.f32.mrf.mxu0 }
 0x11a   : > { %411 = vst [vmem:[%s409_s11 + $0x20] sm:$0xff] %v357_v17  ;;  %364 = vmax.xlane.f32.xlu0 %v357_v17 }
 0x19f   : > { %v363_v21 = vpop.xlane.xlu0 %362 }
 0x1a0   : > { %v366_v22 = vmax.f32 %v360_v20, %v363_v21 }
 0x1a2   : > { %v368_v24 = vsub.f32 %v360_v20, %v366_v22  ;;  %403 = vst.msk [vmem:[#allocation2] sm:$0xff] %vm400_vm2, %v366_v22  ;;  %380 = vperm.xlu1 %688, %v366_v22  }
 0x1a3   : > { %v365_v25 = vpop.xlane.xlu0 %364 }
 0x1a4   : > { %v367_v26 = vmax.f32 %v361_v23, %v365_v25  ;;  %v370_v36 = vmul.f32 1.442695, %v368_v24 }
 0x1a6   : > { %v369_v27 = vsub.f32 %v361_v23, %v367_v26  ;;  %404 = vst.msk [vmem:[#allocation2 + $0x8] sm:$0xff] %vm400_vm2, %v367_v26  ;;  %385 = vperm.xlu1 %688, %v367_v26  }
 0x1a8   : > { %v372_v37 = vmul.f32 1.442695, %v369_v27 }
 0x21d   : > { %v381_v28 = vpop.permute.xlu1 %380 }
 0x21e   : > { %v388_v29 = vsub.f32 %v354_v14, %v381_v28 }
 0x220   : > { %v390_v30 = vmul.f32 1.442695, %v388_v29 }
 0x221   : > { %v386_v31 = vpop.permute.xlu1 %385 }
 0x222   : > { %699 = vpow2.f32 %v390_v30  ;;  %v389_v32 = vsub.f32 %v357_v17, %v386_v31 }
 0x224   : > { %v392_v33 = vmul.f32 1.442695, %v389_v32 }
 0x226   : > { %701 = vpow2.f32 %v392_v33 }
 0x227   : > { %703 = vpow2.f32 %v370_v36 }
 0x228   : > { %705 = vpow2.f32 %v372_v37 }
 0x22f   : > { %v700_v34 = vpop.eup %699 }
 0x230   : > { %394 = vadd.xlane.f32.xlu0 %v700_v34 }
 0x233   : > { %v702_v35 = vpop.eup %701 }
 0x234   : > { %396 = vadd.xlane.f32.xlu1 %v702_v35  ;;  %v704_v38 = vpop.eup %703 }
 0x235   : > { %v376_v40 = vmul.f32 %v704_v38, %v374_v39  ;;  %v706_v41 = vpop.eup %705 }
 0x236   : > { %v377_v45 = vmul.f32 %v706_v41, %v375_v43 }
 0x2b9   : > { %v395_v42 = vpop.xlane.xlu0 %394 }
 0x2ba   : > { %v398_v44 = vadd.f32 %v395_v42, %v376_v40 }
 0x2bc   : > { %401 = vst.msk [vmem:[#allocation3] sm:$0xff] %vm400_vm2, %v398_v44  ;;  %415 = sbr.rel (%p581_p7) target bundleno = 858 (0x35a), region = 44 }
 0x2bd   : > { %v397_v46 = vpop.xlane.xlu1 %396 }
 0x2be   : > { %v399_v47 = vadd.f32 %v397_v46, %v377_v45 }
 0x2c0   : > { %402 = vst.msk [vmem:[#allocation3 + $0x8] sm:$0xff] %vm400_vm2, %v399_v47 }
 0x2c1   : > { %v829_v49 = vmov 0   ;;  %v416_v52 = vld [vmem:[#allocation2] sm:$0xff]  ;;  %v417_v55 = vld [vmem:[#allocation2 + $0x8] sm:$0xff]  ;;  %v428_v61 = vld [vmem:[#allocation7 + $0x10] sm:$0xff] }
 0x2c2   : > { %707 = vset.pattern.permute.xlu0 %v829_v49  ;;  %v426_v59 = vld [vmem:[#allocation7] sm:$0xff]  ;;  %v427_v60 = vld [vmem:[#allocation7 + $0x8] sm:$0xff]  ;;  %v429_v62 = vld [vmem:[#allocation7 + $0x18] sm:$0xff] }
 0x2c3   : > { %v418_v48 = vld [vmem:[#allocation3] sm:$0xff]  ;;  %v430_v4 = vld [vmem:[#allocation7 + $0x20] sm:$0xff]  ;;  %v431_v5 = vld [vmem:[#allocation7 + $0x28] sm:$0xff] }
 0x2c4   : > { %708 = vlog2.f32 %v418_v48  ;;  %v432_v6 = vld [vmem:[#allocation7 + $0x30] sm:$0xff]  ;;  %v433_v7 = vld [vmem:[#allocation7 + $0x38] sm:$0xff] }
 0x2c7   : > { %v419_v50 = vld [vmem:[#allocation3 + $0x8] sm:$0xff] }
 0x2c8   : > { %710 = vlog2.f32 %v419_v50 }
 0x2d1   : > { %v709_v51 = vpop.eup %708 }
 0x2d2   : > { %v421_v54 = vmul.f32 0.6931472, %v709_v51 }
 0x2d4   : > { %v424_v57 = vadd.f32 %v421_v54, %v416_v52 }
 0x2d5   : > { %v711_v53 = vpop.eup %710 }
 0x2d6   : > { %v423_v56 = vmul.f32 0.6931472, %v711_v53  ;;  %436 = vperm.xlu0 %707, %v424_v57  }
 0x2d8   : > { %v425_v58 = vadd.f32 %v423_v56, %v417_v55 }
 0x2da   : > { %441 = vperm.xlu0 %707, %v425_v58  }
 0x351   : > { %v437_v63 = vpop.permute.xlu0 %436 }
 0x352   : > { %v444_v0 = vsub.f32 %v426_v59, %v437_v63  ;;  %v445_v1 = vsub.f32 %v427_v60, %v437_v63  ;;  %v446_v2 = vsub.f32 %v428_v61, %v437_v63  ;;  %v447_v3 = vsub.f32 %v429_v62, %v437_v63 }
 0x354   : > { %452 = vst [vmem:[#allocation7] sm:$0xff] %v444_v0  ;;  %453 = vst [vmem:[#allocation7 + $0x8] sm:$0xff] %v445_v1 }
 0x355   : > { %454 = vst [vmem:[#allocation7 + $0x10] sm:$0xff] %v446_v2  ;;  %455 = vst [vmem:[#allocation7 + $0x18] sm:$0xff] %v447_v3  ;;  %v442_v8 = vpop.permute.xlu0 %441 }
 0x356   : > { %v448_v9 = vsub.f32 %v430_v4, %v442_v8  ;;  %v449_v10 = vsub.f32 %v431_v5, %v442_v8  ;;  %v450_v11 = vsub.f32 %v432_v6, %v442_v8  ;;  %v451_v12 = vsub.f32 %v433_v7, %v442_v8 }
 0x358   : > { %456 = vst [vmem:[#allocation7 + $0x20] sm:$0xff] %v448_v9  ;;  %457 = vst [vmem:[#allocation7 + $0x28] sm:$0xff] %v449_v10 }
 0x359   : > { %458 = vst [vmem:[#allocation7 + $0x30] sm:$0xff] %v450_v11  ;;  %459 = vst [vmem:[#allocation7 + $0x38] sm:$0xff] %v451_v12 }
 0x35a PF: > { %p965_p10 = scmp.eq.s32.totalorder %s560_s18, 3  ;;  %s830_s12 = smov [#allocation7]  }
 0x35b   : > { %s470_s20 = sshll.u32 %s830_s12, 4  ;;  %s471_s20 = int_to_ptr.vmem [resolvable:$true] %s470_s20 }
 0x35c   : > { %s740_s21 = scalar_lea.vmem %s471_s20, 1024  ;;  %p747_p0 = scmp.lt.s32.totalorder %s471_s20, %s471_s20 }
 0x35d   : > { %p741_p11 = scmp.ne.s32.totalorder %s471_s20, %s740_s21  ;;  %p748_p1 = scmp.lt.s32.totalorder %s740_s21, %s740_s21 }
 0x35f   : > { %p742_p12 = pnand %p741_p11, %p965_p10  ;;  %p749_p2 = por %p748_p1, %p747_p0 }
 0x361   : > { %p743_p13 = pneg %p742_p12 }
 0x363   : > { %p750_p3 = pnand %p749_p2, %p743_p13 }
 0x365   : > { %753 = shalt.err (!%p750_p3)
}
 0x366   : > { %s831_s22 = smov 512   ;;  %s832_s18 = smov 32  }
 0x367   : > { %618 = dma.vmem_to_hbm [thread:$0]  (%p965_p10), %s471_s20, 1024, %s1001_s3, [#allocation6], %s831_s22, %s831_s22, %s832_s18  }
 0x368   : > { %793 = dma.done.wait (%p965_p10), [#allocation6], 1024  }
 0x369   : > { %795 = vsyncadd (%p965_p10), [#allocation6], 4294966272 }
 0x36a PF: > { %s17_s17 = sadd.s32 1, %s818_s17   ;;  %s1006_s12 = smov %s802_s13 }
 0x36b   : > { %p14_p4 = scmp.ge.s32.totalorder %s17_s17, 6   ;;  %s1007_s13 = smov %s806_s14 }
 0x36c   : > { %s1008_s14 = smov %s904_s24  ;;  %s1009_s15 = smov %s814_s16 }
 0x36d   : > { %s1010_s16 = smov %s1012_s19  ;;  %16 = sbr.rel (!%p14_p4) target bundleno = 5 (0x5), region = 85 }
 0x372   :  { %486 = vsyncpa [#allocation5], 1 }
 0x373   :  { %488 = vsyncpa [#allocation5 + $0x1], 1 }
 0x374   :  { %489 = vsyncpa [#allocation6], 1 }
 0x375   :  { %491 = vsyncpa [#allocation6 + $0x1], 1 }

</bundles_post_ra>
